<compile_context>
chip_gen: v7x
topology: tpu7x:2x2x1
jax: 0.10.0
libtpu: 0.0.40
codegen_flags: <defaults>
</compile_context>

<pallas_src>
import functools
import math

import jax
import jax.numpy as jnp
from jax.experimental import pallas as pl
from jax.experimental.pallas import tpu as pltpu


_VMEM_LIMIT = 48 * 1024 * 1024   # > 32 MiB scoped default, < v7x 64 MiB physical
_LANE = 128
_TM_DEFAULT = 512                # >=512-row tiles reach ~85% of HBM roofline


def _round_up(x, m):
    return (x + m - 1) // m * m


def _row_tile(m, tm_max=_TM_DEFAULT):
    # Full extent when small (always a legal block); otherwise an 8/128-friendly tile.
    return m if m <= tm_max else tm_max


def _pick_bh_tile(bh, max_tile=16):
    """Largest divisor of bh that is <= max_tile (heads-per-block for attention)."""
    t = min(bh, max_tile)
    while bh % t:
        t -= 1
    return t


# ----------------------------------------------------------------------------
# Kernel 1: fused linear (matmul + bias) -- used for the QKV projection
# ----------------------------------------------------------------------------
def _linear_kernel(x_ref, w_ref, b_ref, o_ref, *, activation):
    acc = jnp.dot(x_ref[...], w_ref[...], preferred_element_type=jnp.float32)
    acc = acc + b_ref[...]
    if activation == "relu":
        acc = jnp.maximum(acc, 0.0)
    o_ref[...] = acc.astype(o_ref.dtype)


def linear(x, w, b, *, activation=None, tm=_TM_DEFAULT):
    """x: (M, K) f32.  w: (K, N) pre-transposed.  b: (N,).  Returns (M, N) f32."""
    M, K = x.shape
    Kw, N = w.shape
    assert K == Kw
    n_pad = _round_up(N, _LANE)            # lane-dense output -> unmasked stores
    if n_pad != N:
        w = jnp.pad(w, ((0, 0), (0, n_pad - N)))
        b = jnp.pad(b, (0, n_pad - N))
    xb = x.astype(jnp.bfloat16)            # bf16 MXU inputs, f32 accumulate
    wb = w.astype(jnp.bfloat16)
    b2 = b.astype(jnp.float32).reshape(1, n_pad)

    tm = _row_tile(M, tm)
    out = pl.pallas_call(
        functools.partial(_linear_kernel, activation=activation),
        out_shape=jax.ShapeDtypeStruct((M, n_pad), jnp.float32),
        grid=(pl.cdiv(M, tm),),
        in_specs=[
            pl.BlockSpec((tm, K), lambda i: (i, 0)),       # x streamed over M
            pl.BlockSpec((K, n_pad), lambda i: (0, 0)),    # weight resident
            pl.BlockSpec((1, n_pad), lambda i: (0, 0)),    # bias resident
        ],
        out_specs=pl.BlockSpec((tm, n_pad), lambda i: (i, 0)),
        compiler_params=pltpu.CompilerParams(
            dimension_semantics=("parallel",),
            vmem_limit_bytes=_VMEM_LIMIT,
        ),
        cost_estimate=pl.CostEstimate(
            flops=2 * M * K * n_pad,
            transcendentals=0,
            bytes_accessed=M * K * 2 + K * n_pad * 2 + n_pad * 4 + M * n_pad * 4,
        ),
    )(xb, wb, b2)
    return out[:, :N] if n_pad != N else out


# ----------------------------------------------------------------------------
# Kernel 2: scaled-dot-product attention, a block of heads per grid step
# ----------------------------------------------------------------------------
def _attention_kernel(q_ref, k_ref, v_ref, o_ref, *, scale):
    q = q_ref[...]                                            # (bh, S, Dh) bf16
    k = k_ref[...]
    v = v_ref[...]
    s = jnp.einsum("bqd,bkd->bqk", q, k,
                   preferred_element_type=jnp.float32) * scale
    m = jnp.max(s, axis=-1, keepdims=True)
    p = jnp.exp(s - m)
    p = p / jnp.sum(p, axis=-1, keepdims=True)
    o = jnp.einsum("bqk,bkd->bqd", p.astype(v.dtype), v,
                   preferred_element_type=jnp.float32)
    o_ref[...] = o.astype(o_ref.dtype)


def attention(qh, kh, vh):
    """qh/kh/vh: (B*H, S, Dh) f32.  Returns (B*H, S, Dh) f32."""
    BH, S, Dh = qh.shape
    scale = 1.0 / math.sqrt(Dh)
    bh_tile = _pick_bh_tile(BH)
    # Note: for production ViT shapes, pack heads so the lane dim is a multiple
    # of 128; at this toy scale (Dh == full extent) the block is still legal.
    mk_spec = lambda: pl.BlockSpec((bh_tile, S, Dh), lambda i: (i, 0, 0))
    return pl.pallas_call(
        functools.partial(_attention_kernel, scale=scale),
        out_shape=jax.ShapeDtypeStruct((BH, S, Dh), jnp.float32),
        grid=(BH // bh_tile,),
        in_specs=[mk_spec(), mk_spec(), mk_spec()],
        out_specs=mk_spec(),
        compiler_params=pltpu.CompilerParams(
            dimension_semantics=("parallel",),
            vmem_limit_bytes=_VMEM_LIMIT,
        ),
        cost_estimate=pl.CostEstimate(
            flops=4 * BH * S * S * Dh,
            transcendentals=BH * S * S,
            bytes_accessed=3 * BH * S * Dh * 2 + BH * S * Dh * 4,
        ),
    )(qh.astype(jnp.bfloat16), kh.astype(jnp.bfloat16), vh.astype(jnp.bfloat16))


# ----------------------------------------------------------------------------
# Kernel 3: fused attention out-projection + residual add + LayerNorm
#   out = LN(x + attn @ W_out + b_out) * gamma + beta
# ----------------------------------------------------------------------------
def _proj_add_ln_kernel(a_ref, x_ref, w_ref, b_ref, g_ref, bb_ref, o_ref, *, eps):
    y = jnp.dot(a_ref[...], w_ref[...],
                preferred_element_type=jnp.float32) + b_ref[...]
    z = x_ref[...] + y
    mu = jnp.mean(z, axis=-1, keepdims=True)
    var = jnp.mean(jnp.square(z - mu), axis=-1, keepdims=True)
    zn = (z - mu) * jax.lax.rsqrt(var + eps)
    o_ref[...] = (zn * g_ref[...] + bb_ref[...]).astype(o_ref.dtype)


def proj_add_layernorm(attn, x, w, b, gamma, beta, *, eps=1e-5, tm=_TM_DEFAULT):
    """attn, x: (M, E) f32.  w: (E, E).  Returns LN(x + attn@w + b)."""
    M, E = x.shape
    tm = _row_tile(M, tm)
    return pl.pallas_call(
        functools.partial(_proj_add_ln_kernel, eps=eps),
        out_shape=jax.ShapeDtypeStruct((M, E), jnp.float32),
        grid=(pl.cdiv(M, tm),),
        in_specs=[
            pl.BlockSpec((tm, E), lambda i: (i, 0)),       # attn (bf16) streamed
            pl.BlockSpec((tm, E), lambda i: (i, 0)),       # residual (f32) streamed
            pl.BlockSpec((E, E), lambda i: (0, 0)),        # weight resident
            pl.BlockSpec((1, E), lambda i: (0, 0)),        # bias resident
            pl.BlockSpec((1, E), lambda i: (0, 0)),        # gamma resident
            pl.BlockSpec((1, E), lambda i: (0, 0)),        # beta resident
        ],
        out_specs=pl.BlockSpec((tm, E), lambda i: (i, 0)),
        compiler_params=pltpu.CompilerParams(
            dimension_semantics=("parallel",),
            vmem_limit_bytes=_VMEM_LIMIT,
        ),
        cost_estimate=pl.CostEstimate(
            flops=2 * M * E * E + 10 * M * E,
            transcendentals=M,
            bytes_accessed=M * E * 2 + M * E * 4 + E * E * 2 + 3 * E * 4 + M * E * 4,
        ),
    )(attn.astype(jnp.bfloat16), x.astype(jnp.float32),
      w.astype(jnp.bfloat16), b.astype(jnp.float32).reshape(1, E),
      gamma.astype(jnp.float32).reshape(1, E),
      beta.astype(jnp.float32).reshape(1, E))


# ----------------------------------------------------------------------------
# Kernel 4: fused FFN block (linear1 + ReLU + linear2 + residual add + LayerNorm)
#   out = LN(x + relu(x@W1 + b1)@W2 + b2) * gamma + beta
#   The (tm, 4E) hidden activation never leaves VMEM.
# ----------------------------------------------------------------------------
def _ffn_block_kernel(x_ref, w1_ref, b1_ref, w2_ref, b2_ref, g_ref, bb_ref,
                      o_ref, *, eps):
    x = x_ref[...]                                            # (tm, E) f32
    xb = x.astype(jnp.bfloat16)
    h = jnp.dot(xb, w1_ref[...], preferred_element_type=jnp.float32) + b1_ref[...]
    h = jnp.maximum(h, 0.0)
    y = jnp.dot(h.astype(jnp.bfloat16), w2_ref[...],
                preferred_element_type=jnp.float32) + b2_ref[...]
    z = x + y
    mu = jnp.mean(z, axis=-1, keepdims=True)
    var = jnp.mean(jnp.square(z - mu), axis=-1, keepdims=True)
    zn = (z - mu) * jax.lax.rsqrt(var + eps)
    o_ref[...] = (zn * g_ref[...] + bb_ref[...]).astype(o_ref.dtype)


def ffn_block(x, w1, b1, w2, b2, gamma, beta, *, eps=1e-5, tm=_TM_DEFAULT):
    """x: (M, E) f32.  w1: (E, F).  w2: (F, E).  Returns LN(x + FFN(x))."""
    M, E = x.shape
    _, F = w1.shape
    tm = _row_tile(M, tm)
    return pl.pallas_call(
        functools.partial(_ffn_block_kernel, eps=eps),
        out_shape=jax.ShapeDtypeStruct((M, E), jnp.float32),
        grid=(pl.cdiv(M, tm),),
        in_specs=[
            pl.BlockSpec((tm, E), lambda i: (i, 0)),       # x streamed (f32)
            pl.BlockSpec((E, F), lambda i: (0, 0)),        # W1 resident (bf16)
            pl.BlockSpec((1, F), lambda i: (0, 0)),        # b1 resident
            pl.BlockSpec((F, E), lambda i: (0, 0)),        # W2 resident (bf16)
            pl.BlockSpec((1, E), lambda i: (0, 0)),        # b2 resident
            pl.BlockSpec((1, E), lambda i: (0, 0)),        # gamma resident
            pl.BlockSpec((1, E), lambda i: (0, 0)),        # beta resident
        ],
        out_specs=pl.BlockSpec((tm, E), lambda i: (i, 0)),
        compiler_params=pltpu.CompilerParams(
            dimension_semantics=("parallel",),
            vmem_limit_bytes=_VMEM_LIMIT,
        ),
        cost_estimate=pl.CostEstimate(
            flops=4 * M * E * F + 12 * M * E,
            transcendentals=M,
            bytes_accessed=M * E * 4 + 2 * E * F * 2 + (F + 3 * E) * 4 + M * E * 4,
        ),
    )(x.astype(jnp.float32), w1.astype(jnp.bfloat16),
      b1.astype(jnp.float32).reshape(1, F), w2.astype(jnp.bfloat16),
      b2.astype(jnp.float32).reshape(1, E),
      gamma.astype(jnp.float32).reshape(1, E),
      beta.astype(jnp.float32).reshape(1, E))


# ----------------------------------------------------------------------------
# Pure-jnp mirrors (references; same math / dtype recipe as the kernels)
# ----------------------------------------------------------------------------
def _layernorm_f32(z, gamma, beta, eps):
    mu = jnp.mean(z, axis=-1, keepdims=True)
    var = jnp.mean(jnp.square(z - mu), axis=-1, keepdims=True)
    zn = (z - mu) * jax.lax.rsqrt(var + eps)
    return zn * gamma[None, :] + beta[None, :]


def _linear_ref(x, w, b, *, activation, compute_dtype):
    acc = jnp.dot(x.astype(compute_dtype), w.astype(compute_dtype),
                  preferred_element_type=jnp.float32)
    acc = acc + b.astype(jnp.float32)[None, :]
    if activation == "relu":
        acc = jnp.maximum(acc, 0.0)
    return acc


def _attention_ref(qh, kh, vh, *, compute_dtype):
    Dh = qh.shape[-1]
    scale = 1.0 / math.sqrt(Dh)
    q = qh.astype(compute_dtype)
    k = kh.astype(compute_dtype)
    v = vh.astype(compute_dtype)
    s = jnp.einsum("bqd,bkd->bqk", q, k,
                   preferred_element_type=jnp.float32) * scale
    m = jnp.max(s, axis=-1, keepdims=True)
    p = jnp.exp(s - m)
    p = p / jnp.sum(p, axis=-1, keepdims=True)
    return jnp.einsum("bqk,bkd->bqd", p.astype(compute_dtype), v,
                      preferred_element_type=jnp.float32)


def _proj_add_ln_ref(attn, x, w, b, gamma, beta, *, eps=1e-5, compute_dtype):
    y = jnp.dot(attn.astype(compute_dtype), w.astype(compute_dtype),
                preferred_element_type=jnp.float32) + b[None, :]
    z = x.astype(jnp.float32) + y
    return _layernorm_f32(z, gamma, beta, eps)


def _ffn_block_ref(x, w1, b1, w2, b2, gamma, beta, *, eps=1e-5, compute_dtype):
    xb = x.astype(compute_dtype)
    h = jnp.dot(xb, w1.astype(compute_dtype),
                preferred_element_type=jnp.float32) + b1[None, :]
    h = jnp.maximum(h, 0.0)
    y = jnp.dot(h.astype(compute_dtype), w2.astype(compute_dtype),
                preferred_element_type=jnp.float32) + b2[None, :]
    z = x.astype(jnp.float32) + y
    return _layernorm_f32(z, gamma, beta, eps)


# ----------------------------------------------------------------------------
# Encoder forward (matches nn.TransformerEncoderLayer post-norm, eval mode)
# ----------------------------------------------------------------------------
def encoder_layer(src, p, num_heads, *, impl="pallas", compute_dtype=jnp.bfloat16):
    S, B, E = src.shape
    H = num_heads
    Dh = E // H
    M = S * B

    if impl == "pallas":
        lin = lambda x, w, b, act=None: linear(x, w, b, activation=act)
        attn_fn = attention
        proj_ln = proj_add_layernorm
        ffn = ffn_block
    else:
        lin = lambda x, w, b, act=None: _linear_ref(
            x, w, b, activation=act, compute_dtype=compute_dtype)
        attn_fn = lambda q, k, v: _attention_ref(q, k, v, compute_dtype=compute_dtype)
        proj_ln = functools.partial(_proj_add_ln_ref, compute_dtype=compute_dtype)
        ffn = functools.partial(_ffn_block_ref, compute_dtype=compute_dtype)

    x = src.reshape(M, E).astype(jnp.float32)

    # --- self-attention block (post-norm) ---
    qkv = lin(x, p["in_w"], p["in_b"])                       # (M, 3E)
    q, k, v = qkv[:, :E], qkv[:, E:2 * E], qkv[:, 2 * E:]

    def split_heads(t):                                      # (M, E) -> (B*H, S, Dh)
        return t.reshape(S, B, H, Dh).transpose(1, 2, 0, 3).reshape(B * H, S, Dh)

    oh = attn_fn(split_heads(q), split_heads(k), split_heads(v))
    attn_merged = oh.reshape(B, H, S, Dh).transpose(2, 0, 1, 3).reshape(M, E)
    # out-proj + residual + LayerNorm fused (dropout1 == identity in eval mode)
    x = proj_ln(attn_merged, x, p["out_w"], p["out_b"], p["ln1_g"], p["ln1_b"])

    # --- feed-forward block: linear1+ReLU+linear2+residual+LayerNorm fused ---
    x = ffn(x, p["ff1_w"], p["ff1_b"], p["ff2_w"], p["ff2_b"],
            p["ln2_g"], p["ln2_b"])                          # dropout2 == identity

    return x.reshape(S, B, E)


def transformer_encoder(src, layer_params, num_heads, *, impl="pallas",
                        compute_dtype=jnp.bfloat16):
    x = src
    for p in layer_params:
        x = encoder_layer(x, p, num_heads, impl=impl, compute_dtype=compute_dtype)
    return x
    # TODO(synk): dropout (p=0.1) in the PyTorch layer is train-mode only; omitted here.


def init_layer_params(key, embed_dim):
    """Weights stored pre-transposed to (in_features, out_features) ONCE here
    (when porting torch weights, transpose torch's (out, in) layout here, not per call)."""
    E = embed_dim
    F = 4 * E
    ks = jax.random.split(key, 8)
    s_e = 1.0 / math.sqrt(E)
    s_f = 1.0 / math.sqrt(F)
    return {
        "in_w": jax.random.normal(ks[0], (E, 3 * E), jnp.float32) * s_e,
        "in_b": jax.random.normal(ks[1], (3 * E,), jnp.float32) * 0.02,
        "out_w": jax.random.normal(ks[2], (E, E), jnp.float32) * s_e,
        "out_b": jax.random.normal(ks[3], (E,), jnp.float32) * 0.02,
        "ff1_w": jax.random.normal(ks[4], (E, F), jnp.float32) * s_e,
        "ff1_b": jax.random.normal(ks[5], (F,), jnp.float32) * 0.02,
        "ff2_w": jax.random.normal(ks[6], (F, E), jnp.float32) * s_f,
        "ff2_b": jax.random.normal(ks[7], (E,), jnp.float32) * 0.02,
        "ln1_g": jnp.ones((E,), jnp.float32),
        "ln1_b": jnp.zeros((E,), jnp.float32),
        "ln2_g": jnp.ones((E,), jnp.float32),
        "ln2_b": jnp.zeros((E,), jnp.float32),
    }


if __name__ == "__main__":
    # batch_first=False (PyTorch default): src is (seq, batch, embed_dim).
    S, B, E, H, DEPTH = 8, 2, 32, 4, 2
    key = jax.random.PRNGKey(0)
    k_src, *k_layers = jax.random.split(key, DEPTH + 1)
    src = jax.random.normal(k_src, (S, B, E), dtype=jnp.float32)
    layer_params = [init_layer_params(k, E) for k in k_layers]

    out = transformer_encoder(src, layer_params, H, impl="pallas")
    out = jax.block_until_ready(out)
    assert out.shape == (S, B, E)

    # (a) tight check vs a jnp reference using the identical bf16-matmul /
    #     f32-accumulate recipe (isolates Pallas-kernel correctness).
    ref_bf16 = transformer_encoder(src, layer_params, H, impl="jnp",
                                   compute_dtype=jnp.bfloat16)
    assert jnp.allclose(out, ref_bf16, atol=2e-3, rtol=2e-3), \
        float(jnp.max(jnp.abs(out - ref_bf16)))

    # (b) loose sanity check vs the full-f32 PyTorch-semantics reference
    #     (bounds the bf16-compute deviation).
    ref_f32 = transformer_encoder(src, layer_params, H, impl="jnp",
                                  compute_dtype=jnp.float32)
    assert jnp.allclose(out, ref_f32, atol=1e-1, rtol=1e-1), \
        float(jnp.max(jnp.abs(out - ref_f32)))

    print("KERNEL_OK")
</pallas_src>

<mosaic_0001>
module attributes {stable_mosaic.version = 11 : i64} {
  func.func @_linear_kernel(%arg0: i32, %arg1: memref<16x32xbf16, #tpu.memory_space<vmem>>, %arg2: memref<32x128xbf16, #tpu.memory_space<vmem>>, %arg3: memref<1x128xf32, #tpu.memory_space<vmem>>, %arg4: memref<16x128xf32, #tpu.memory_space<vmem>>) attributes {dimension_semantics = [#tpu.dimension_semantics<parallel>], iteration_bounds = array<i64: 1>, scalar_prefetch = 0 : i64, scratch_operands = 0 : i64, tpu.core_type = #tpu.core_type<tc>, window_params = [{transform_indices = @transform_0, window_bounds = array<i64: 16, 32>}, {pipeline_mode = #tpu.pipeline_mode<synchronous>, transform_indices = @transform_1, window_bounds = array<i64: 32, 128>}, {pipeline_mode = #tpu.pipeline_mode<synchronous>, transform_indices = @transform_2, window_bounds = array<i64: 1, 128>}, {transform_indices = @transform_3, window_bounds = array<i64: 16, 128>}]} {
    %c0 = arith.constant 0 : index
    %c0_0 = arith.constant 0 : index
    %0 = vector.load %arg1[%c0, %c0_0] : memref<16x32xbf16, #tpu.memory_space<vmem>>, vector<16x32xbf16>
    %c0_1 = arith.constant 0 : index
    %c0_2 = arith.constant 0 : index
    %1 = vector.load %arg2[%c0_1, %c0_2] : memref<32x128xbf16, #tpu.memory_space<vmem>>, vector<32x128xbf16>
    %cst = arith.constant dense<0.000000e+00> : vector<16x128xf32>
    %2 = tpu.matmul %0, %1, %cst {dimension_numbers = #tpu.dot_dimension_numbers<[1], [0], [0], [1], [0, 0, 1, 1], [], []>} : vector<16x32xbf16>, vector<32x128xbf16>, vector<16x128xf32> -> vector<16x128xf32>
    %c0_3 = arith.constant 0 : index
    %c0_4 = arith.constant 0 : index
    %3 = vector.load %arg3[%c0_3, %c0_4] : memref<1x128xf32, #tpu.memory_space<vmem>>, vector<1x128xf32>
    %4 = vector.broadcast %3 : vector<1x128xf32> to vector<16x128xf32>
    %5 = arith.addf %2, %4 : vector<16x128xf32>
    %c0_5 = arith.constant 0 : index
    %c0_6 = arith.constant 0 : index
    %6 = vector.load %arg4[%c0_5, %c0_6] : memref<16x128xf32, #tpu.memory_space<vmem>>, vector<16x128xf32>
    tpu.vector_store %arg4[%c0_5, %c0_6], %5 {strides = array<i32>} : memref<16x128xf32, #tpu.memory_space<vmem>>, vector<16x128xf32>,
    return
  }
  func.func @transform_0(%arg0: i32) -> (i32, i32) {
    %c0_i32 = arith.constant 0 : i32
    %c0_i32_0 = arith.constant 0 : i32
    return %arg0, %c0_i32 : i32, i32
  }
  func.func @transform_1(%arg0: i32) -> (i32, i32) {
    %c0_i32 = arith.constant 0 : i32
    %c0_i32_0 = arith.constant 0 : i32
    %c0_i32_1 = arith.constant 0 : i32
    return %c0_i32, %c0_i32_0 : i32, i32
  }
  func.func @transform_2(%arg0: i32) -> (i32, i32) {
    %c0_i32 = arith.constant 0 : i32
    %c0_i32_0 = arith.constant 0 : i32
    %c0_i32_1 = arith.constant 0 : i32
    return %c0_i32, %c0_i32_0 : i32, i32
  }
  func.func @transform_3(%arg0: i32) -> (i32, i32) {
    %c0_i32 = arith.constant 0 : i32
    %c0_i32_0 = arith.constant 0 : i32
    return %arg0, %c0_i32 : i32, i32
  }
}

</mosaic_0001>

<bundles_post_ra>
// kernel: tpu_custom_call.1
= control target key start
LH: loop header
LB: loop body
LE: loop exit
PB: predicated region body
PF: predicated region fallthrough
CT: control target
= control target key end

     0   :  { %8 = vsyncpa [#allocation3], 0  ;;  %s307_s0 = inlined_call_operand.hbm [shape: bf16[16,32], index: 0, kind: input, shape index: {}]   ;;  %s308_s1 = inlined_call_operand.hbm [shape: bf16[32,128], index: 1, kind: input, shape index: {}]   ;;  %s309_s2 = inlined_call_operand.vmem [shape: f32[1,128], index: 2, kind: input, shape index: {}]   ;;  %s310_s3 = inlined_call_operand.hbm [shape: f32[16,128], index: 3, kind: output, shape index: {}]  }
   0x1   :  { %9 = vsyncpa [#allocation6], 0 }
   0x2   :  { %10 = vsyncpa [#allocation4], 0  ;;  %s239_s12 = smov [#allocation2]   ;;  %s167_s16 = scalar_lea.hbm %s307_s0, 128 }
   0x3   :  { %s16_s13 = sshll.u32 %s239_s12, 4  ;;  %p168_p0 = scmp.ne.s32.totalorder %s307_s0, %s167_s16  ;;  %s17_s13 = int_to_ptr.vmem [resolvable:$true] %s16_s13 }
   0x4   :  { %p171_p1 = scmp.lt.u32.totalorder %s167_s16, %s307_s0 }
   0x6   :  { %p173_p2 = pnand %p171_p1, %p168_p0 }
   0x8   :  { %176 = shalt.err (!%p173_p2)
}
   0x9   :  { %s177_s21 = scalar_lea.vmem %s17_s13, 128  ;;  %p182_p4 = scmp.lt.s32.totalorder %s17_s13, %s17_s13 }
   0xa   :  { %p178_p3 = scmp.ne.s32.totalorder %s17_s13, %s177_s21  ;;  %p183_p5 = scmp.lt.s32.totalorder %s177_s21, %s177_s21 }
   0xc   :  { %p184_p6 = por %p183_p5, %p182_p4 }
   0xe   :  { %p185_p7 = pnand %p184_p6, %p178_p3 }
  0x10   :  { %188 = shalt.err (!%p185_p7)
}
  0x11   :  { %s240_s22 = smov 64   ;;  %s241_s23 = smov 4  }
  0x12   :  { %22 = dma.hbm_to_vmem [thread:$0]  %s307_s0, 128, %s17_s13, [#allocation3], %s240_s22, %s240_s22, %s241_s23  }
  0x13   :  { %s242_s26 = smov [#allocation5]   ;;  %s189_s30 = scalar_lea.hbm %s308_s1, 256 }
  0x14   :  { %s28_s27 = sshll.u32 %s242_s26, 4  ;;  %p190_p8 = scmp.ne.s32.totalorder %s308_s1, %s189_s30  ;;  %s29_s27 = int_to_ptr.vmem [resolvable:$true] %s28_s27 }
  0x15   :  { %p193_p9 = scmp.lt.u32.totalorder %s189_s30, %s308_s1 }
  0x17   :  { %p195_p10 = pnand %p193_p9, %p190_p8 }
  0x19   :  { %198 = shalt.err (!%p195_p10)
}
  0x1a   :  { %s199_s8 = scalar_lea.vmem %s29_s27, 256  ;;  %p204_p12 = scmp.lt.s32.totalorder %s29_s27, %s29_s27 }
  0x1b   :  { %p200_p11 = scmp.ne.s32.totalorder %s29_s27, %s199_s8  ;;  %p205_p13 = scmp.lt.s32.totalorder %s199_s8, %s199_s8 }
  0x1d   :  { %p206_p0 = por %p205_p13, %p204_p12 }
  0x1f   :  { %p207_p1 = pnand %p206_p0, %p200_p11 }
  0x21   :  { %210 = shalt.err (!%p207_p1)
}
  0x22   :  { %34 = dma.hbm_to_vmem [thread:$0]  %s308_s1, 256, %s29_s27, [#allocation6], %s240_s22, %s240_s22, %s241_s23  }
  0x23   :  { %233 = dma.done.wait [#allocation3], 128  }
  0x24   :  { %234 = vsyncadd [#allocation3], 4294967168 }
  0x25   :  { %235 = dma.done.wait [#allocation6], 256  }
  0x26   :  { %236 = vsyncadd [#allocation6], 4294967040  ;;  %v243_v0 = vmov 0.0   ;;  %vm244_vm0 = vmmov 0   ;;  %v164_v1 = vld [vmem:[#allocation5] sm:$0xff]   ;;  %v165_v2 = vld [vmem:[#allocation5 + $0x8] sm:$0xff]  }
  0x27   :  { %147 = vmatprep.subr.bf16.mxu0 %v243_v0  ;;  %151 = vmatprep.mubr.msk.bf16.mxu0 %vm244_vm0, %v243_v0  ;;  %v166_v3 = vld [vmem:[#allocation2] sm:$0xff]   ;;  %vm74_vm1 = vcmask 261120   ;;  %s245_s1 = smov [#allocation7]  }
  0x28   :  { %148 = vmatpush3.bf16.msra.mxu0 %v164_v1  ;;  %v139_v4 = vld [vmem:[%s309_s2] ss:$0 sm:$0xff]  ;;  %s126_s12 = sshll.u32 %s245_s1, 4  ;;  %s127_s12 = int_to_ptr.vmem [resolvable:$true] %s126_s12 }
  0x29   :  { %149 = vmatprep.subr.bf16.mxu0 %v243_v0  ;;  %s211_s13 = scalar_lea.vmem %s127_s12, 256  ;;  %p216_p3 = scmp.lt.s32.totalorder %s127_s12, %s127_s12 }
  0x2a   :  { %p212_p2 = scmp.ne.s32.totalorder %s127_s12, %s211_s13  ;;  %p217_p4 = scmp.lt.s32.totalorder %s211_s13, %s211_s13 }
  0x2c   :  { %150 = vmatpush3.bf16.msra.mxu0 %v165_v2  ;;  %p218_p5 = por %p217_p4, %p216_p3 }
  0x2e   :  { %p219_p6 = pnand %p218_p5, %p212_p2 }
  0x2f   :  { %152 = vmatmul.mubr.msk.bf16.vlgmr.msra.gmra.mrb[0].mxu0 %vm74_vm1, %v166_v3 }
 0x102   :  { %v112_v5 = vpop.f32.mrb[0].mxu0 }
 0x103   :  { %v113_v6 = vadd.f32 %v139_v4, %v112_v5  ;;  %v153_v7 = vpop.f32.mrb[1].mxu0 }
 0x104   :  { %v115_v8 = vpop.f32.mrb[2].mxu0 }
 0x105   :  { %119 = vst [vmem:[#allocation7] sm:$0xff] %v113_v6  ;;  %v116_v9 = vadd.f32 %v139_v4, %v115_v8  ;;  %v154_v10 = vpop.f32.mrb[3].mxu0 }
 0x107   :  { %120 = vst [vmem:[#allocation7 + $0x8] sm:$0xff] %v116_v9 }
 0x108   :  { %222 = shalt.err (!%p219_p6)
}
 0x109   :  { %s223_s15 = scalar_lea.hbm %s310_s3, 256 }
 0x10a   :  { %p224_p7 = scmp.ne.s32.totalorder %s310_s3, %s223_s15  ;;  %p227_p8 = scmp.lt.u32.totalorder %s223_s15, %s310_s3 }
 0x10c   :  { %p229_p9 = pnand %p227_p8, %p224_p7 }
 0x10e   :  { %232 = shalt.err (!%p229_p9)
}
 0x10f   :  { %s246_s20 = smov 128   ;;  %s247_s21 = smov 8  }
 0x110   :  { %132 = dma.vmem_to_hbm [thread:$0]  %s127_s12, 256, %s310_s3, [#allocation4], %s246_s20, %s246_s20, %s247_s21  }
 0x111   :  { %237 = dma.done.wait [#allocation4], 256  }
 0x112   :  { %238 = vsyncadd [#allocation4], 4294967040 }
 0x113   :  { %136 = vsyncpa [#allocation3], 1 }
 0x114   :  { %137 = vsyncpa [#allocation6], 1 }
 0x115   :  { %138 = vsyncpa [#allocation4], 1 }

</bundles_post_ra>
